<compile_context>
chip_gen: v5e
topology: v5e:2x2
jax: 0.10.0
libtpu: 0.0.40
codegen_flags: <defaults>
</compile_context>

<pallas_src>
import jax
import jax.numpy as jnp
from jax.experimental import pallas as pl
from jax.experimental.pallas import tpu as pltpu


def make_cnn1d_kernel(N, C, L, K, p1, d1, p2, d2, eps):
    NL = N * L
    inv_nl = 1.0 / float(NL)

    def kernel(x_ref, w1_ref, g1_ref, be1_ref, w2_ref, g2_ref, be2_ref, out_ref):
        x = x_ref[...]                                   # (C, N*L) f32, lane-dense

        # In-batch lane position, computed once and shared by all taps / layers.
        lane = jax.lax.broadcasted_iota(jnp.int32, (C, NL), 1)
        l_in = lane % L

        def unfold(v, pad, dil):
            """(C, N*L) f32 -> (K*C, N*L) bf16: K per-batch shifted, edge-masked taps."""
            taps = []
            for k in range(K):
                off = k * dil - pad                      # static python int
                if off == 0:
                    # Center tap is always valid: no mask, just the MXU-operand cast.
                    taps.append(v.astype(jnp.bfloat16))
                    continue
                # Lane rotation on the XLU; lanes whose source falls in the per-batch
                # zero padding (or wrapped across a batch boundary by the roll) are
                # zeroed by a single-compare mask on the in-batch position.
                rolled = pltpu.roll(v, (-off) % NL, axis=1)
                valid = (l_in < L - off) if off > 0 else (l_in >= -off)
                taps.append(jnp.where(valid, rolled, 0.0).astype(jnp.bfloat16))
            return jnp.concatenate(taps, axis=0)         # (K*C, N*L) bf16

        # ---- conv1: one MXU matmul (bf16 operands, f32 accumulate). Bias dropped:
        #      a per-channel bias is exactly cancelled by the batch-stat BN below. ----
        y = jnp.dot(w1_ref[...], unfold(x, p1, d1),
                    preferred_element_type=jnp.float32)

        # ---- BN1: single-pass batch stats over lanes = (N, L), folded scale/shift, ReLU ----
        m1 = jnp.sum(y, axis=1, keepdims=True) * inv_nl           # (C, 1)
        q1 = jnp.sum(y * y, axis=1, keepdims=True) * inv_nl       # E[y^2]
        v1 = jnp.maximum(q1 - m1 * m1, 0.0)                       # clamp: cancellation
        a1 = g1_ref[...] * jax.lax.rsqrt(v1 + eps)
        c1 = be1_ref[...] - m1 * a1
        y = jnp.maximum(a1 * y + c1, 0.0)

        # ---- conv2 (dilated): one MXU matmul, bias dropped ----
        z = jnp.dot(w2_ref[...], unfold(y, p2, d2),
                    preferred_element_type=jnp.float32)

        # ---- BN2 (single-pass stats) + residual + ReLU, lane-dense store ----
        m2 = jnp.sum(z, axis=1, keepdims=True) * inv_nl
        q2 = jnp.sum(z * z, axis=1, keepdims=True) * inv_nl
        v2 = jnp.maximum(q2 - m2 * m2, 0.0)
        a2 = g2_ref[...] * jax.lax.rsqrt(v2 + eps)
        c2 = be2_ref[...] - m2 * a2
        out_ref[...] = jnp.maximum(a2 * z + c2 + x, 0.0).astype(out_ref.dtype)

    return kernel


def cnn1d_forward(x, params, *, kernel_size, dilation=1, ds=2):
    """Pallas forward of CNN1D. x: (N, C, L) float32; params in PyTorch layout."""
    N, C, L = x.shape
    K = kernel_size
    p1 = (K - 1) // 2 * dilation
    p2 = (K - 1) // 2 * dilation * ds
    d1 = dilation
    d2 = dilation * ds
    eps = 1e-16
    NL = N * L

    # Conv biases are NOT passed to the kernel: training-mode BN's per-channel
    # mean subtraction cancels them exactly (valid only while BN uses batch stats).
    w1, _b1, g1, be1, w2, _b2, g2, be2 = params
    # PyTorch (out, in, K) -> (out, K, in) -> (out, K*in): k-major, in-channel-minor
    # row order matching the in-kernel unfolded operand. bf16 for the MXU.
    w1f = jnp.transpose(w1, (0, 2, 1)).reshape(C, K * C).astype(jnp.bfloat16)
    w2f = jnp.transpose(w2, (0, 2, 1)).reshape(C, K * C).astype(jnp.bfloat16)
    col = lambda v: v.reshape(C, 1).astype(jnp.float32)

    # Lane-dense layout: (N, C, L) -> (C, N*L); reshaped back after the call.
    x2d = jnp.transpose(x.astype(jnp.float32), (1, 0, 2)).reshape(C, NL)

    kernel = make_cnn1d_kernel(N, C, L, K, p1, d1, p2, d2, eps)
    vmem = pl.BlockSpec(memory_space=pltpu.MemorySpace.VMEM)

    # Rough live-VMEM estimate (f32 x/y/z/out + two bf16 K-tap unfolded operands
    # + weights) with generous headroom, kept inside v7x's 64 MiB physical VMEM.
    est = 4 * C * NL * 6 + 2 * (K * C) * NL * 2 + 2 * (K * C) * C * 2
    vmem_limit = int(min(64 * 1024 * 1024, max(6 * est, 32 * 1024 * 1024)))

    out2d = pl.pallas_call(
        kernel,
        out_shape=jax.ShapeDtypeStruct((C, NL), jnp.float32),
        in_specs=[vmem] * 7,
        out_specs=vmem,
        compiler_params=pltpu.CompilerParams(vmem_limit_bytes=vmem_limit),
    )(x2d, w1f, col(g1), col(be1), w2f, col(g2), col(be2))

    return jnp.transpose(out2d.reshape(C, N, L), (1, 0, 2))


def ref_forward(x, params, *, kernel_size, dilation=1, ds=2):
    """Pure-JAX reference mirroring the PyTorch forward (training-mode BN, with biases)."""
    w1, b1, g1, be1, w2, b2, g2, be2 = params
    K = kernel_size
    eps = 1e-16

    def conv1d(inp, w, b, pad, dil):
        L = inp.shape[-1]
        xp = jnp.pad(inp, ((0, 0), (0, 0), (pad, pad)))
        out = sum(
            jnp.einsum('oi,nil->nol', w[:, :, k], xp[:, :, k * dil:k * dil + L],
                       precision=jax.lax.Precision.HIGHEST)
            for k in range(K))
        return out + b[None, :, None]

    def bn(y, g, be):
        m = jnp.mean(y, axis=(0, 2), keepdims=True)
        v = jnp.mean((y - m) ** 2, axis=(0, 2), keepdims=True)
        return (y - m) / jnp.sqrt(v + eps) * g[None, :, None] + be[None, :, None]

    p1 = (K - 1) // 2 * dilation
    p2 = (K - 1) // 2 * dilation * ds
    y = jax.nn.relu(bn(conv1d(x, w1, b1, p1, dilation), g1, be1))
    z = bn(conv1d(y, w2, b2, p2, dilation * ds), g2, be2)
    return jax.nn.relu(z + x)


if __name__ == "__main__":
    # Small shapes consistent with the module; residual requires in_ch == hidden_ch.
    # L chosen so the merged lane axis N*L = 128 is dense/128-aligned (unmasked stores).
    N, C, L, K = 2, 8, 64, 3
    dilation, ds = 1, 2

    key = jax.random.PRNGKey(0)
    kx, kw1, kb1, kw2, kb2, kg1, kbe1, kg2, kbe2 = jax.random.split(key, 9)
    x = jax.random.normal(kx, (N, C, L), jnp.float32)
    w1 = jax.random.normal(kw1, (C, C, K), jnp.float32) * 0.2   # PyTorch (out, in, K)
    b1 = jax.random.normal(kb1, (C,), jnp.float32) * 0.1
    w2 = jax.random.normal(kw2, (C, C, K), jnp.float32) * 0.2
    b2 = jax.random.normal(kb2, (C,), jnp.float32) * 0.1
    g1 = 1.0 + 0.1 * jax.random.normal(kg1, (C,), jnp.float32)
    be1 = 0.1 * jax.random.normal(kbe1, (C,), jnp.float32)
    g2 = 1.0 + 0.1 * jax.random.normal(kg2, (C,), jnp.float32)
    be2 = 0.1 * jax.random.normal(kbe2, (C,), jnp.float32)
    params = (w1, b1, g1, be1, w2, b2, g2, be2)

    out = cnn1d_forward(x, params, kernel_size=K, dilation=dilation, ds=ds)
    out = jax.block_until_ready(out)

    ref = jax.block_until_ready(
        ref_forward(x, params, kernel_size=K, dilation=dilation, ds=ds))
    assert out.shape == (N, C, L)
    assert bool(jnp.allclose(out, ref, atol=2e-2, rtol=2e-2)), \
        f"max abs err = {float(jnp.max(jnp.abs(out - ref)))}"

    print("KERNEL_OK")
</pallas_src>

<mosaic_0001>
module attributes {stable_mosaic.version = 11 : i64} {
  func.func @kernel(%arg0: memref<8x128xf32, #tpu.memory_space<vmem>>, %arg1: memref<8x24xbf16, #tpu.memory_space<vmem>>, %arg2: memref<8x1xf32, #tpu.memory_space<vmem>>, %arg3: memref<8x1xf32, #tpu.memory_space<vmem>>, %arg4: memref<8x24xbf16, #tpu.memory_space<vmem>>, %arg5: memref<8x1xf32, #tpu.memory_space<vmem>>, %arg6: memref<8x1xf32, #tpu.memory_space<vmem>>, %arg7: memref<8x128xf32, #tpu.memory_space<vmem>>) attributes {dimension_semantics = [], scalar_prefetch = 0 : i64, scratch_operands = 0 : i64, tpu.core_type = #tpu.core_type<tc>} {
    %c0 = arith.constant 0 : index
    %c0_0 = arith.constant 0 : index
    %0 = vector.load %arg0[%c0, %c0_0] : memref<8x128xf32, #tpu.memory_space<vmem>>, vector<8x128xf32>
    %1 = tpu.iota {dimensions = array<i32: 1>} : vector<8x128xi32>
    %c64_i32 = arith.constant 64 : i32
    %c0_i32 = arith.constant 0 : i32
    %2 = arith.cmpi eq, %c64_i32, %c0_i32 : i32
    %c1_i32 = arith.constant 1 : i32
    %3 = arith.select %2, %c1_i32, %c64_i32 : i32
    %4 = vector.broadcast %3 : i32 to vector<8x128xi32>
    %5 = arith.remsi %1, %4 : vector<8x128xi32>
    %c0_i32_1 = arith.constant 0 : i32
    %6 = vector.broadcast %c0_i32_1 : i32 to vector<8x128xi32>
    %7 = arith.cmpi ne, %5, %6 : vector<8x128xi32>
    %c0_i32_2 = arith.constant 0 : i32
    %8 = vector.broadcast %c0_i32_2 : i32 to vector<8x128xi32>
    %9 = arith.cmpi slt, %5, %8 : vector<8x128xi32>
    %c0_i32_3 = arith.constant 0 : i32
    %10 = arith.cmpi slt, %3, %c0_i32_3 : i32
    %11 = vector.broadcast %10 : i1 to vector<8x128xi1>
    %12 = vector.broadcast %11 : vector<8x128xi1> to vector<8x128xi1>
    %13 = arith.xori %9, %12 : vector<8x128xi1>
    %14 = arith.andi %13, %7 : vector<8x128xi1>
    %15 = vector.broadcast %3 : i32 to vector<8x128xi32>
    %16 = arith.addi %5, %15 : vector<8x128xi32>
    %17 = arith.select %14, %16, %5 : vector<8x128xi1>, vector<8x128xi32>
    %c0_4 = arith.constant 0 : index
    %c0_5 = arith.constant 0 : index
    %18 = vector.load %arg1[%c0_4, %c0_5] : memref<8x24xbf16, #tpu.memory_space<vmem>>, vector<8x24xbf16>
    %c1_i32_6 = arith.constant 1 : i32
    %19 = tpu.dynamic_rotate %0 by %c1_i32_6 dim 1 : vector<8x128xf32>, i32 -> vector<8x128xf32>
    %c1_i32_7 = arith.constant 1 : i32
    %20 = vector.broadcast %c1_i32_7 : i32 to vector<8x128xi32>
    %21 = arith.cmpi sge, %17, %20 : vector<8x128xi32>
    %cst = arith.constant 0.000000e+00 : f32
    %22 = vector.broadcast %cst : f32 to vector<8x128xf32>
    %23 = arith.select %21, %19, %22 : vector<8x128xi1>, vector<8x128xf32>
    %24 = arith.truncf %23 : vector<8x128xf32> to vector<8x128xbf16>
    %25 = arith.truncf %0 : vector<8x128xf32> to vector<8x128xbf16>
    %c127_i32 = arith.constant 127 : i32
    %26 = tpu.dynamic_rotate %0 by %c127_i32 dim 1 : vector<8x128xf32>, i32 -> vector<8x128xf32>
    %c63_i32 = arith.constant 63 : i32
    %27 = vector.broadcast %c63_i32 : i32 to vector<8x128xi32>
    %28 = arith.cmpi slt, %17, %27 : vector<8x128xi32>
    %cst_8 = arith.constant 0.000000e+00 : f32
    %29 = vector.broadcast %cst_8 : f32 to vector<8x128xf32>
    %30 = arith.select %28, %26, %29 : vector<8x128xi1>, vector<8x128xf32>
    %31 = arith.truncf %30 : vector<8x128xf32> to vector<8x128xbf16>
    %32 = tpu.concatenate %24, %25, %31 in 0 : vector<8x128xbf16>, vector<8x128xbf16>, vector<8x128xbf16> -> vector<24x128xbf16>
    %cst_9 = arith.constant dense<0.000000e+00> : vector<8x128xf32>
    %33 = tpu.matmul %18, %32, %cst_9 {dimension_numbers = #tpu.dot_dimension_numbers<[1], [0], [0], [1], [0, 0, 1, 1], [], []>} : vector<8x24xbf16>, vector<24x128xbf16>, vector<8x128xf32> -> vector<8x128xf32>
    %cst_10 = arith.constant dense<0.000000e+00> : vector<8xf32>
    %34 = vector.multi_reduction <add>, %33, %cst_10 [1] : vector<8x128xf32> to vector<8xf32>
    %35 = vector.shape_cast %34 : vector<8xf32> to vector<8x1xf32>
    %cst_11 = arith.constant 7.812500e-03 : f32
    %36 = vector.broadcast %cst_11 : f32 to vector<8x1xf32>
    %37 = arith.mulf %35, %36 : vector<8x1xf32>
    %38 = arith.mulf %33, %33 : vector<8x128xf32>
    %cst_12 = arith.constant dense<0.000000e+00> : vector<8xf32>
    %39 = vector.multi_reduction <add>, %38, %cst_12 [1] : vector<8x128xf32> to vector<8xf32>
    %40 = vector.shape_cast %39 : vector<8xf32> to vector<8x1xf32>
    %cst_13 = arith.constant 7.812500e-03 : f32
    %41 = vector.broadcast %cst_13 : f32 to vector<8x1xf32>
    %42 = arith.mulf %40, %41 : vector<8x1xf32>
    %43 = arith.mulf %37, %37 : vector<8x1xf32>
    %44 = arith.subf %42, %43 : vector<8x1xf32>
    %cst_14 = arith.constant 0.000000e+00 : f32
    %45 = vector.broadcast %cst_14 : f32 to vector<8x1xf32>
    %46 = arith.maximumf %44, %45 : vector<8x1xf32>
    %c0_15 = arith.constant 0 : index
    %c0_16 = arith.constant 0 : index
    %47 = vector.load %arg2[%c0_15, %c0_16] : memref<8x1xf32, #tpu.memory_space<vmem>>, vector<8x1xf32>
    %cst_17 = arith.constant 1.000000e-16 : f32
    %48 = vector.broadcast %cst_17 : f32 to vector<8x1xf32>
    %49 = arith.addf %46, %48 : vector<8x1xf32>
    %50 = math.rsqrt %49 : vector<8x1xf32>
    %51 = arith.mulf %47, %50 : vector<8x1xf32>
    %c0_18 = arith.constant 0 : index
    %c0_19 = arith.constant 0 : index
    %52 = vector.load %arg3[%c0_18, %c0_19] : memref<8x1xf32, #tpu.memory_space<vmem>>, vector<8x1xf32>
    %53 = arith.mulf %37, %51 : vector<8x1xf32>
    %54 = arith.subf %52, %53 : vector<8x1xf32>
    %55 = vector.broadcast %51 : vector<8x1xf32> to vector<8x128xf32>
    %56 = arith.mulf %55, %33 : vector<8x128xf32>
    %57 = vector.broadcast %54 : vector<8x1xf32> to vector<8x128xf32>
    %58 = arith.addf %56, %57 : vector<8x128xf32>
    %cst_20 = arith.constant 0.000000e+00 : f32
    %59 = vector.broadcast %cst_20 : f32 to vector<8x128xf32>
    %60 = arith.maximumf %58, %59 : vector<8x128xf32>
    %c0_21 = arith.constant 0 : index
    %c0_22 = arith.constant 0 : index
    %61 = vector.load %arg4[%c0_21, %c0_22] : memref<8x24xbf16, #tpu.memory_space<vmem>>, vector<8x24xbf16>
    %c2_i32 = arith.constant 2 : i32
    %62 = tpu.dynamic_rotate %60 by %c2_i32 dim 1 : vector<8x128xf32>, i32 -> vector<8x128xf32>
    %c2_i32_23 = arith.constant 2 : i32
    %63 = vector.broadcast %c2_i32_23 : i32 to vector<8x128xi32>
    %64 = arith.cmpi sge, %17, %63 : vector<8x128xi32>
    %cst_24 = arith.constant 0.000000e+00 : f32
    %65 = vector.broadcast %cst_24 : f32 to vector<8x128xf32>
    %66 = arith.select %64, %62, %65 : vector<8x128xi1>, vector<8x128xf32>
    %67 = arith.truncf %66 : vector<8x128xf32> to vector<8x128xbf16>
    %68 = arith.truncf %60 : vector<8x128xf32> to vector<8x128xbf16>
    %c126_i32 = arith.constant 126 : i32
    %69 = tpu.dynamic_rotate %60 by %c126_i32 dim 1 : vector<8x128xf32>, i32 -> vector<8x128xf32>
    %c62_i32 = arith.constant 62 : i32
    %70 = vector.broadcast %c62_i32 : i32 to vector<8x128xi32>
    %71 = arith.cmpi slt, %17, %70 : vector<8x128xi32>
    %cst_25 = arith.constant 0.000000e+00 : f32
    %72 = vector.broadcast %cst_25 : f32 to vector<8x128xf32>
    %73 = arith.select %71, %69, %72 : vector<8x128xi1>, vector<8x128xf32>
    %74 = arith.truncf %73 : vector<8x128xf32> to vector<8x128xbf16>
    %75 = tpu.concatenate %67, %68, %74 in 0 : vector<8x128xbf16>, vector<8x128xbf16>, vector<8x128xbf16> -> vector<24x128xbf16>
    %cst_26 = arith.constant dense<0.000000e+00> : vector<8x128xf32>
    %76 = tpu.matmul %61, %75, %cst_26 {dimension_numbers = #tpu.dot_dimension_numbers<[1], [0], [0], [1], [0, 0, 1, 1], [], []>} : vector<8x24xbf16>, vector<24x128xbf16>, vector<8x128xf32> -> vector<8x128xf32>
    %cst_27 = arith.constant dense<0.000000e+00> : vector<8xf32>
    %77 = vector.multi_reduction <add>, %76, %cst_27 [1] : vector<8x128xf32> to vector<8xf32>
    %78 = vector.shape_cast %77 : vector<8xf32> to vector<8x1xf32>
    %cst_28 = arith.constant 7.812500e-03 : f32
    %79 = vector.broadcast %cst_28 : f32 to vector<8x1xf32>
    %80 = arith.mulf %78, %79 : vector<8x1xf32>
    %81 = arith.mulf %76, %76 : vector<8x128xf32>
    %cst_29 = arith.constant dense<0.000000e+00> : vector<8xf32>
    %82 = vector.multi_reduction <add>, %81, %cst_29 [1] : vector<8x128xf32> to vector<8xf32>
    %83 = vector.shape_cast %82 : vector<8xf32> to vector<8x1xf32>
    %cst_30 = arith.constant 7.812500e-03 : f32
    %84 = vector.broadcast %cst_30 : f32 to vector<8x1xf32>
    %85 = arith.mulf %83, %84 : vector<8x1xf32>
    %86 = arith.mulf %80, %80 : vector<8x1xf32>
    %87 = arith.subf %85, %86 : vector<8x1xf32>
    %cst_31 = arith.constant 0.000000e+00 : f32
    %88 = vector.broadcast %cst_31 : f32 to vector<8x1xf32>
    %89 = arith.maximumf %87, %88 : vector<8x1xf32>
    %c0_32 = arith.constant 0 : index
    %c0_33 = arith.constant 0 : index
    %90 = vector.load %arg5[%c0_32, %c0_33] : memref<8x1xf32, #tpu.memory_space<vmem>>, vector<8x1xf32>
    %cst_34 = arith.constant 1.000000e-16 : f32
    %91 = vector.broadcast %cst_34 : f32 to vector<8x1xf32>
    %92 = arith.addf %89, %91 : vector<8x1xf32>
    %93 = math.rsqrt %92 : vector<8x1xf32>
    %94 = arith.mulf %90, %93 : vector<8x1xf32>
    %c0_35 = arith.constant 0 : index
    %c0_36 = arith.constant 0 : index
    %95 = vector.load %arg6[%c0_35, %c0_36] : memref<8x1xf32, #tpu.memory_space<vmem>>, vector<8x1xf32>
    %96 = arith.mulf %80, %94 : vector<8x1xf32>
    %97 = arith.subf %95, %96 : vector<8x1xf32>
    %98 = vector.broadcast %94 : vector<8x1xf32> to vector<8x128xf32>
    %99 = arith.mulf %98, %76 : vector<8x128xf32>
    %100 = vector.broadcast %97 : vector<8x1xf32> to vector<8x128xf32>
    %101 = arith.addf %99, %100 : vector<8x128xf32>
    %102 = arith.addf %101, %0 : vector<8x128xf32>
    %cst_37 = arith.constant 0.000000e+00 : f32
    %103 = vector.broadcast %cst_37 : f32 to vector<8x128xf32>
    %104 = arith.maximumf %102, %103 : vector<8x128xf32>
    %c0_38 = arith.constant 0 : index
    %c0_39 = arith.constant 0 : index
    %105 = vector.load %arg7[%c0_38, %c0_39] : memref<8x128xf32, #tpu.memory_space<vmem>>, vector<8x128xf32>
    tpu.vector_store %arg7[%c0_38, %c0_39], %104 {strides = array<i32>} : memref<8x128xf32, #tpu.memory_space<vmem>>, vector<8x128xf32>,
    return
  }
}

</mosaic_0001>

<bundles_post_ra>
// kernel: tpu_custom_call.1
= control target key start
LH: loop header
LB: loop body
LE: loop exit
PB: predicated region body
PF: predicated region fallthrough
CT: control target
= control target key end

     0   :  { %s347_s0 = inlined_call_operand.vmem [shape: f32[8,128], index: 0, kind: input, shape index: {}]   ;;  %s348_s1 = inlined_call_operand.vmem [shape: bf16[8,24], index: 1, kind: input, shape index: {}]   ;;  %s349_s2 = inlined_call_operand.vmem [shape: f32[8,1], index: 2, kind: input, shape index: {}]   ;;  %s350_s3 = inlined_call_operand.vmem [shape: f32[8,1], index: 3, kind: input, shape index: {}]   ;;  %s351_s4 = inlined_call_operand.vmem [shape: bf16[8,24], index: 4, kind: input, shape index: {}]   ;;  %s352_s5 = inlined_call_operand.vmem [shape: f32[8,1], index: 5, kind: input, shape index: {}]   ;;  %s353_s6 = inlined_call_operand.vmem [shape: f32[8,1], index: 6, kind: input, shape index: {}]   ;;  %s354_s7 = inlined_call_operand.hbm [shape: f32[8,128], index: 7, kind: output, shape index: {}]  }
   0x1   :  { %v307_v0 = vld [vmem:[%s347_s0] sm:$0xff] }
   0x2   :  { %12 = vsyncpa [#allocation3], 0  ;;  %s258_s26 = smov 127   ;;  %s259_s27 = smov 1   ;;  %v29_v1 = vlaneseq  ;;  %v49_v5 = vpack.c.bf16 %v307_v0, %v307_v0  ;;  %vm58_vm1 = vcmask 1043456   ;;  %vm63_vm3 = vcmask 195584  }
   0x3   :  { %50 = vrot.lane.b32.xlu0 %v307_v0, %s258_s26  ;;  %v43_v15 = vld [vmem:[%s348_s1] sm:$0xf]  ;;  %v260_v19 = vmov 0   ;;  %s261_s9 = smov 2   ;;  %s263_s14 = smov [#allocation2]  }
   0x4   :  { %v30_v2 = vand.u32 127, %v29_v1  ;;  %v56_v9 = vunpack.c.l.b16 %v49_v5  ;;  %225 = vset.pattern.permute.xlu2 %v260_v19  ;;  %226 = vset.pattern.permute.xlu1 %v260_v19  ;;  %v93_v33 = vld [vmem:[%s349_s2] sm:$0xff]  ;;  %s262_s2 = smov 126   ;;  %s206_s15 = sshll.u32 %s263_s14, 4  ;;  %s207_s15 = int_to_ptr.vmem [resolvable:$true] %s206_s15 }
   0x5   :  { %227 = vset.pattern.permute.xlu0 %v260_v19  ;;  %v106_v38 = vld [vmem:[%s350_s3] sm:$0xff]  ;;  %s208_s17 = sshll.u32 %s354_s7, 4  ;;  %s209_s17 = int_to_ptr.hbm [resolvable:$true] %s208_s17 }
   0x6   :  { %v311_v3 = vand.u32 63, %v30_v2  ;;  %v57_v11 = vpack.c.b16 %v56_v9, %v56_v9  ;;  %v122_v56 = vld [vmem:[%s351_s4] sm:$0xf] }
   0x8   :  { %vm52_vm0 = vcmp.lt.s32.totalorder %v311_v3, 63  ;;  %vm46_vm2 = vcmp.ge.s32.totalorder %v311_v3, 1  ;;  %vm125_vm7 = vcmp.ge.s32.totalorder %v311_v3, 2  ;;  %vm131_vm8 = vcmp.lt.s32.totalorder %v311_v3, 62 }
   0xb   :  { %44 = vrot.lane.b32.xlu0 %v307_v0, %s259_s27 }
  0x75   :  { %v51_v4 = vpop.permute.xlu0 %50 }
  0x76   :  { %v53_v6 = vsel %vm52_vm0, %v51_v4, 0.0 }
  0x77   :  { %v54_v7 = vpack.c.bf16 %v53_v6, %v53_v6 }
  0x79   :  { %v68_v8 = vsel %vm58_vm1, %v54_v7, 0 }
  0x7a   :  { %76 = vmatpush.bf16.msra.mxu0 %v68_v8 }
  0x7d   :  { %v45_v10 = vpop.permute.xlu0 %44 }
  0x7e   :  { %v47_v12 = vsel %vm46_vm2, %v45_v10, 0.0  ;;  %v170_v10 = vld [vmem:[%s352_s5] sm:$0xff] }
  0x7f   :  { %v48_v13 = vpack.c.bf16 %v47_v12, %v47_v12 }
  0x81   :  { %v61_v14 = vsel %vm58_vm1, %v48_v13, %v57_v11 }
  0x82   :  { %77 = vmatpush.bf16.msra.mxu0 %v61_v14 }
  0x85   :  { %217 = vmatmul.msk.bf16.vlgmr.msra.gmra.mxu0 %vm63_vm3, %v43_v15  ;;  %v183_v15 = vld [vmem:[%s353_s6] sm:$0xff] }
 0x102   :  { %v79_v16 = vpop.f32.mrf.mxu0 }
 0x103   :  { %83 = vadd.xlane.f32.xlu1 %v79_v16  ;;  %v86_v17 = vmul.f32 %v79_v16, %v79_v16 }
 0x10a   :  { %v81_v18 = vpop.f32.mrf.mxu0 }
 0x10b   :  { %87 = vadd.xlane.f32.xlu1 %v86_v17 }
 0x176   :  { %v84_v20 = vpop.xlane.xlu1 %83 }
 0x177   :  { %v85_v21 = vmul.f32 0.0078125, %v84_v20 }
 0x179   :  { %v90_v23 = vmul.f32 %v85_v21, %v85_v21 }
 0x17e   :  { %v88_v22 = vpop.xlane.xlu1 %87 }
 0x17f   :  { %v89_v24 = vmul.f32 0.0078125, %v88_v22 }
 0x181   :  { %v91_v25 = vsub.f32 %v89_v24, %v90_v23 }
 0x183   :  { %v92_v26 = vmax.f32 %v91_v25, 0.0 }
 0x185   :  { %v94_v27 = vadd.f32 1e-16, %v92_v26 }
 0x187   :  { %228 = vrsqrt.f32 %v94_v27  ;;  %vm101_vm5 = vweird.f32 %v94_v27 }
 0x18d   :  { %v229_v28 = vpop.eup %228 }
 0x18e   :  { %v96_v29 = vmul.f32 %v229_v28, %v94_v27  ;;  %vm102_vm4 = vweird.f32 %v229_v28 }
 0x18f   :  { %vm103_vm6 = vmor %vm101_vm5, %vm102_vm4 }
 0x190   :  { %v97_v30 = vmul.f32 %v229_v28, %v96_v29 }
 0x192   :  { %v98_v31 = vmul.f32 0.5, %v97_v30 }
 0x194   :  { %v99_v32 = vsub.f32 1.5, %v98_v31 }
 0x196   :  { %v100_v34 = vmul.f32 %v229_v28, %v99_v32 }
 0x198   :  { %v104_v35 = vsel %vm103_vm6, %v229_v28, %v100_v34 }
 0x199   :  { %v105_v36 = vmul.f32 %v104_v35, %v93_v33 }
 0x19b   :  { %111 = vperm.xlu2 %225, %v105_v36   ;;  %v107_v37 = vmul.f32 %v105_v36, %v85_v21 }
 0x19d   :  { %v108_v39 = vsub.f32 %v106_v38, %v107_v37 }
 0x1a3   :  { %117 = vperm.xlu2 %225, %v108_v39  }
 0x1f5   :  { %v112_v40 = vpop.permute.xlu2 %111 }
 0x1f6   :  { %v114_v41 = vmul.f32 %v112_v40, %v79_v16 }
 0x1fd   :  { %v118_v42 = vpop.permute.xlu2 %117 }
 0x1fe   :  { %v120_v43 = vadd.f32 %v118_v42, %v114_v41 }
 0x200   :  { %v121_v44 = vmax.f32 %v120_v43, 0.0 }
 0x202   :  { %123 = vrot.lane.b32.xlu1 %v121_v44, %s261_s9  ;;  %129 = vrot.lane.b32.xlu0 %v121_v44, %s262_s2  ;;  %v128_v45 = vpack.c.bf16 %v121_v44, %v121_v44 }
 0x204   :  { %v135_v51 = vunpack.c.l.b16 %v128_v45 }
 0x206   :  { %v136_v54 = vpack.c.b16 %v135_v51, %v135_v51 }
 0x274   :  { %v124_v46 = vpop.permute.xlu1 %123  ;;  %v130_v47 = vpop.permute.xlu0 %129 }
 0x275   :  { %v126_v48 = vsel %vm125_vm7, %v124_v46, 0.0  ;;  %v132_v49 = vsel %vm131_vm8, %v130_v47, 0.0 }
 0x276   :  { %v133_v50 = vpack.c.bf16 %v132_v49, %v132_v49  ;;  %v127_v52 = vpack.c.bf16 %v126_v48, %v126_v48 }
 0x278   :  { %v145_v53 = vsel %vm58_vm1, %v133_v50, 0  ;;  %v139_v55 = vsel %vm58_vm1, %v127_v52, %v136_v54 }
 0x279   :  { %153 = vmatpush.bf16.msra.mxu1 %v145_v53 }
 0x27d   :  { %154 = vmatpush.bf16.msra.mxu1 %v139_v55 }
 0x280   :  { %218 = vmatmul.msk.bf16.vlgmr.msra.gmra.mxu1 %vm63_vm3, %v122_v56 }
 0x2fd   :  { %v156_v57 = vpop.f32.mrf.mxu1 }
 0x2fe   :  { %160 = vadd.xlane.f32.xlu2 %v156_v57  ;;  %v163_v58 = vmul.f32 %v156_v57, %v156_v57 }
 0x300   :  { %164 = vadd.xlane.f32.xlu0 %v163_v58 }
 0x305   :  { %v158_v59 = vpop.f32.mrf.mxu1 }
 0x371   :  { %v161_v60 = vpop.xlane.xlu2 %160 }
 0x372   :  { %v162_v61 = vmul.f32 0.0078125, %v161_v60 }
 0x373   :  { %v165_v62 = vpop.xlane.xlu0 %164 }
 0x374   :  { %v167_v63 = vmul.f32 %v162_v61, %v162_v61  ;;  %v166_v1 = vmul.f32 0.0078125, %v165_v62 }
 0x376   :  { %v168_v2 = vsub.f32 %v166_v1, %v167_v63 }
 0x378   :  { %v169_v3 = vmax.f32 %v168_v2, 0.0 }
 0x37a   :  { %v171_v4 = vadd.f32 1e-16, %v169_v3 }
 0x37c   :  { %230 = vrsqrt.f32 %v171_v4  ;;  %vm178_vm10 = vweird.f32 %v171_v4 }
 0x382   :  { %v231_v5 = vpop.eup %230 }
 0x383   :  { %v173_v6 = vmul.f32 %v231_v5, %v171_v4  ;;  %vm179_vm9 = vweird.f32 %v231_v5 }
 0x384   :  { %vm180_vm11 = vmor %vm178_vm10, %vm179_vm9 }
 0x385   :  { %v174_v7 = vmul.f32 %v231_v5, %v173_v6 }
 0x387   :  { %v175_v8 = vmul.f32 0.5, %v174_v7 }
 0x389   :  { %v176_v9 = vsub.f32 1.5, %v175_v8 }
 0x38b   :  { %v177_v11 = vmul.f32 %v231_v5, %v176_v9 }
 0x38d   :  { %v181_v12 = vsel %vm180_vm11, %v231_v5, %v177_v11 }
 0x38e   :  { %v182_v13 = vmul.f32 %v181_v12, %v170_v10 }
 0x390   :  { %188 = vperm.xlu1 %226, %v182_v13   ;;  %v184_v14 = vmul.f32 %v182_v13, %v162_v61 }
 0x392   :  { %v185_v16 = vsub.f32 %v183_v15, %v184_v14 }
 0x398   :  { %194 = vperm.xlu1 %226, %v185_v16  }
 0x402   :  { %v189_v17 = vpop.permute.xlu1 %188 }
 0x403   :  { %v191_v18 = vmul.f32 %v189_v17, %v156_v57 }
 0x40a   :  { %v195_v19 = vpop.permute.xlu1 %194 }
 0x40b   :  { %v197_v20 = vadd.f32 %v195_v19, %v191_v18 }
 0x40d   :  { %v198_v21 = vadd.f32 %v197_v20, %v307_v0 }
 0x40f   :  { %v199_v22 = vmax.f32 %v198_v21, 0.0 }
 0x411   :  { %200 = vst [vmem:[#allocation2] sm:$0xff] %v199_v22 }
 0x412   :  { %211 = dma.vmem_to_hbm [thread:$0]  %s207_s15, 128, %s209_s17, [#allocation3]  }
 0x413   :  { %256 = dma.done.wait [#allocation3], 128  }
 0x414   :  { %257 = vsyncadd [#allocation3], 4294967168 }
 0x415   :  { %216 = vsyncpa [#allocation3], 1 }

</bundles_post_ra>
